<compile_context>
chip_gen: v7x
topology: tpu7x:2x2x1
jax: 0.10.0
libtpu: 0.0.40
codegen_flags: <defaults>
</compile_context>

<pallas_src>
import functools

import jax
import jax.numpy as jnp
from jax import lax
from jax.experimental import pallas as pl
from jax.experimental.pallas import tpu as pltpu


def _tv_kernel(ia_ref, if_ref, out_ref, *, D, H, W, TB, CH, B_total):
    """Per-grid-step partial sums of the three TV squared-difference terms."""
    HW = H * W
    L = D * HW
    n_chunks = TB // CH
    need_row_mask = (B_total % TB) != 0
    # lane-tile-aligned static slice for the D difference when possible
    d_slice = (D > 1) and (HW % 128 == 0)

    g = pl.program_id(0)
    if need_row_mask:
        valid_rows = jnp.minimum(TB, B_total - g * TB)           # scalar
        row_iota = lax.broadcasted_iota(jnp.int32, (CH, 1), 0)   # (CH, 1)

    # Lane-position masks: built once per grid step (loop invariant).
    pos = lax.broadcasted_iota(jnp.int32, (1, L), 1)
    keep_d = (pos < (D - 1) * HW) if (D > 1 and not d_slice) else None
    keep_h = ((pos % HW) < (H - 1) * W) if H > 1 else None
    keep_w = ((pos % W) != (W - 1)) if W > 1 else None

    def masked_sum(sq, keep, row_ok):
        if keep is not None and row_ok is not None:
            keep = jnp.logical_and(keep, row_ok)
        elif keep is None:
            keep = row_ok
        if keep is not None:
            sq = jnp.where(keep, sq, 0.0)
        # lane reduce, then sublane reduce; keep everything >= 2-D
        return jnp.sum(sq, axis=1, keepdims=True).sum(axis=0, keepdims=True)

    def chunk_body(c, carry):
        s_d, s_h, s_w = carry
        r0 = pl.multiple_of(c * CH, CH)
        r = (ia_ref[pl.ds(r0, CH), :].astype(jnp.float32)
             - if_ref[pl.ds(r0, CH), :].astype(jnp.float32))
        row_ok = ((row_iota + r0) < valid_rows) if need_row_mask else None

        if D > 1:
            if d_slice:
                dd = r[:, HW:] - r[:, :L - HW]
                s_d = s_d + masked_sum(dd * dd, None, row_ok)
            else:
                dd = pltpu.roll(r, L - HW, axis=1) - r
                s_d = s_d + masked_sum(dd * dd, keep_d, row_ok)
        if H > 1:
            dh = pltpu.roll(r, L - W, axis=1) - r
            s_h = s_h + masked_sum(dh * dh, keep_h, row_ok)
        if W > 1:
            dw = pltpu.roll(r, L - 1, axis=1) - r
            s_w = s_w + masked_sum(dw * dw, keep_w, row_ok)
        return s_d, s_h, s_w

    zero = jnp.zeros((1, 1), jnp.float32)
    s_d, s_h, s_w = lax.fori_loop(0, n_chunks, chunk_body, (zero, zero, zero),
                                  unroll=n_chunks <= 4)

    # Per-block partials in lanes 0..2 of a lane-dense (1, 1, 128) output.
    lane = lax.broadcasted_iota(jnp.int32, (1, 1, 128), 2)
    out_ref[...] = jnp.where(
        lane == 0, s_d,
        jnp.where(lane == 1, s_h, jnp.where(lane == 2, s_w, 0.0)))


def _tpu_vmem_budget():
    """(target bytes per input block, vmem_limit_bytes) per TPU generation."""
    try:
        cap = int(pltpu.get_tpu_info().vmem_capacity_bytes)
    except Exception:
        cap = None
    if cap is not None and cap >= (96 << 20):
        return 8 << 20, 96 << 20      # v5e / v6e: 128 MiB physical VMEM
    return 4 << 20, 40 << 20          # v7x (64 MiB) or unknown / interpret


def _choose_tb(B, row_bytes, mult, target_bytes):
    """Rows per block: ~target_bytes per input block, sublane-multiple aligned."""
    rows = max(1, target_bytes // row_bytes)
    if rows >= B:
        # Whole problem fits in one block: if alignment allows, split in two so
        # the "parallel" grid axis can use both v7x TensorCores.
        if B >= 2 * mult:
            half = -(-B // 2)
            return min(B, -(-half // mult) * mult)
        return B
    tb = max(mult, (rows // mult) * mult)
    return min(tb, B)


def tv_loss(IA, IF):
    assert IA.shape == IF.shape and IA.ndim == 5
    N, C, D, H, W = IA.shape
    B = N * C
    L = D * H * W

    ia = IA.reshape(B, L)
    iff = IF.reshape(B, L)

    itemsize = jnp.dtype(IA.dtype).itemsize
    mult = {1: 32, 2: 16}.get(itemsize, 8)      # sublane packing of the dtype
    target_blk, vmem_limit = _tpu_vmem_budget()
    TB = _choose_tb(B, L * itemsize, mult, target_blk)
    G = -(-B // TB)                             # cdiv; no input padding
    CH = mult if (TB % mult == 0) else TB       # rows per in-kernel chunk

    kernel = functools.partial(_tv_kernel, D=D, H=H, W=W,
                               TB=TB, CH=CH, B_total=B)

    partials = pl.pallas_call(
        kernel,
        out_shape=jax.ShapeDtypeStruct((G, 1, 128), jnp.float32),
        grid_spec=pltpu.PrefetchScalarGridSpec(
            num_scalar_prefetch=0,
            grid=(G,),
            in_specs=[
                pl.BlockSpec((TB, L), lambda g: (g, 0)),
                pl.BlockSpec((TB, L), lambda g: (g, 0)),
            ],
            out_specs=pl.BlockSpec((1, 1, 128), lambda g: (g, 0, 0)),
        ),
        compiler_params=pltpu.CompilerParams(
            dimension_semantics=("parallel",),
            vmem_limit_bytes=vmem_limit),
        cost_estimate=pl.CostEstimate(
            flops=10 * B * L,
            transcendentals=0,
            bytes_accessed=2 * B * L * itemsize + G * 128 * 4),
    )(ia, iff)

    # Final reduce + per-term mean denominators (match torch .mean() counts).
    sums = jnp.sum(partials[:, 0, :3], axis=0)
    n1 = float(B * (D - 1) * H * W)
    n2 = float(B * D * (H - 1) * W)
    n3 = float(B * D * H * (W - 1))
    # NOTE: a size-1 D/H/W dim yields 0/0 == NaN, same as torch's empty mean.
    return sums[0] / n1 + sums[1] / n2 + sums[2] / n3


def tv_loss_ref(IA, IF):
    # pure-JAX reference for sanity checking
    r = (IA - IF).astype(jnp.float32)
    tv1 = jnp.mean((r[:, :, 1:, :, :] - r[:, :, :-1, :, :]) ** 2)
    tv2 = jnp.mean((r[:, :, :, 1:, :] - r[:, :, :, :-1, :]) ** 2)
    tv3 = jnp.mean((r[:, :, :, :, 1:] - r[:, :, :, :, :-1]) ** 2)
    return tv1 + tv2 + tv3


if __name__ == "__main__":
    key = jax.random.PRNGKey(0)
    k1, k2 = jax.random.split(key)
    # [N, C, D, H, W]  ->  B = 8 rows, L = D*H*W = 2048 lanes (lane-dense)
    IA = jax.random.normal(k1, (2, 4, 8, 16, 16), dtype=jnp.float32)
    IF = jax.random.normal(k2, (2, 4, 8, 16, 16), dtype=jnp.float32)

    out = jax.block_until_ready(tv_loss(IA, IF))
    ref = tv_loss_ref(IA, IF)
    assert jnp.allclose(out, ref, rtol=1e-5, atol=1e-5), (out, ref)
    print("KERNEL_OK")
</pallas_src>

<mosaic_0001>
module attributes {stable_mosaic.version = 11 : i64} {
  func.func @_tv_kernel(%arg0: i32, %arg1: memref<8x2048xf32, #tpu.memory_space<vmem>>, %arg2: memref<8x2048xf32, #tpu.memory_space<vmem>>, %arg3: memref<1x1x128xf32, #tpu.memory_space<vmem>>) attributes {dimension_semantics = [#tpu.dimension_semantics<parallel>], iteration_bounds = array<i64: 1>, scalar_prefetch = 0 : i64, scratch_operands = 0 : i64, tpu.core_type = #tpu.core_type<tc>, window_params = [{transform_indices = @transform_0, window_bounds = array<i64: 8, 2048>}, {transform_indices = @transform_1, window_bounds = array<i64: 8, 2048>}, {transform_indices = @transform_2, window_bounds = array<i64: 1, 1, 128>}]} {
    %0 = tpu.iota {dimensions = array<i32: 1>} : vector<1x2048xi32>
    %c256_i32 = arith.constant 256 : i32
    %c0_i32 = arith.constant 0 : i32
    %1 = arith.cmpi eq, %c256_i32, %c0_i32 : i32
    %c1_i32 = arith.constant 1 : i32
    %2 = arith.select %1, %c1_i32, %c256_i32 : i32
    %3 = vector.broadcast %2 : i32 to vector<1x2048xi32>
    %4 = arith.remsi %0, %3 : vector<1x2048xi32>
    %c0_i32_0 = arith.constant 0 : i32
    %5 = vector.broadcast %c0_i32_0 : i32 to vector<1x2048xi32>
    %6 = arith.cmpi ne, %4, %5 : vector<1x2048xi32>
    %c0_i32_1 = arith.constant 0 : i32
    %7 = vector.broadcast %c0_i32_1 : i32 to vector<1x2048xi32>
    %8 = arith.cmpi slt, %4, %7 : vector<1x2048xi32>
    %c0_i32_2 = arith.constant 0 : i32
    %9 = arith.cmpi slt, %2, %c0_i32_2 : i32
    %10 = vector.broadcast %9 : i1 to vector<1x2048xi1>
    %11 = vector.broadcast %10 : vector<1x2048xi1> to vector<1x2048xi1>
    %12 = arith.xori %8, %11 : vector<1x2048xi1>
    %13 = arith.andi %12, %6 : vector<1x2048xi1>
    %14 = vector.broadcast %2 : i32 to vector<1x2048xi32>
    %15 = arith.addi %4, %14 : vector<1x2048xi32>
    %16 = arith.select %13, %15, %4 : vector<1x2048xi1>, vector<1x2048xi32>
    %c240_i32 = arith.constant 240 : i32
    %17 = vector.broadcast %c240_i32 : i32 to vector<1x2048xi32>
    %18 = arith.cmpi slt, %16, %17 : vector<1x2048xi32>
    %c16_i32 = arith.constant 16 : i32
    %c0_i32_3 = arith.constant 0 : i32
    %19 = arith.cmpi eq, %c16_i32, %c0_i32_3 : i32
    %c1_i32_4 = arith.constant 1 : i32
    %20 = arith.select %19, %c1_i32_4, %c16_i32 : i32
    %21 = vector.broadcast %20 : i32 to vector<1x2048xi32>
    %22 = arith.remsi %0, %21 : vector<1x2048xi32>
    %c0_i32_5 = arith.constant 0 : i32
    %23 = vector.broadcast %c0_i32_5 : i32 to vector<1x2048xi32>
    %24 = arith.cmpi ne, %22, %23 : vector<1x2048xi32>
    %c0_i32_6 = arith.constant 0 : i32
    %25 = vector.broadcast %c0_i32_6 : i32 to vector<1x2048xi32>
    %26 = arith.cmpi slt, %22, %25 : vector<1x2048xi32>
    %c0_i32_7 = arith.constant 0 : i32
    %27 = arith.cmpi slt, %20, %c0_i32_7 : i32
    %28 = vector.broadcast %27 : i1 to vector<1x2048xi1>
    %29 = vector.broadcast %28 : vector<1x2048xi1> to vector<1x2048xi1>
    %30 = arith.xori %26, %29 : vector<1x2048xi1>
    %31 = arith.andi %30, %24 : vector<1x2048xi1>
    %32 = vector.broadcast %20 : i32 to vector<1x2048xi32>
    %33 = arith.addi %22, %32 : vector<1x2048xi32>
    %34 = arith.select %31, %33, %22 : vector<1x2048xi1>, vector<1x2048xi32>
    %c15_i32 = arith.constant 15 : i32
    %35 = vector.broadcast %c15_i32 : i32 to vector<1x2048xi32>
    %36 = arith.cmpi ne, %34, %35 : vector<1x2048xi32>
    %cst = arith.constant 0.000000e+00 : f32
    %37 = vector.broadcast %cst : f32 to vector<1x1xf32>
    %c0_i32_8 = arith.constant 0 : i32
    %c8_i32 = arith.constant 8 : i32
    %38 = arith.muli %c0_i32_8, %c8_i32 : i32
    %39 = tpu.assume_multiple %38, 8 : i32
    %40 = arith.index_cast %39 : i32 to index
    %c0 = arith.constant 0 : index
    %41 = vector.load %arg1[%40, %c0] : memref<8x2048xf32, #tpu.memory_space<vmem>>, vector<8x2048xf32>
    %42 = arith.index_cast %39 : i32 to index
    %c0_9 = arith.constant 0 : index
    %43 = vector.load %arg2[%42, %c0_9] : memref<8x2048xf32, #tpu.memory_space<vmem>>, vector<8x2048xf32>
    %44 = arith.subf %41, %43 : vector<8x2048xf32>
    %45 = vector.extract_strided_slice %44 {offsets = [0, 256], sizes = [8, 1792], strides = [1, 1]} : vector<8x2048xf32> to vector<8x1792xf32>
    %46 = vector.extract_strided_slice %44 {offsets = [0, 0], sizes = [8, 1792], strides = [1, 1]} : vector<8x2048xf32> to vector<8x1792xf32>
    %47 = arith.subf %45, %46 : vector<8x1792xf32>
    %48 = arith.mulf %47, %47 : vector<8x1792xf32>
    %cst_10 = arith.constant dense<0.000000e+00> : vector<8xf32>
    %49 = vector.multi_reduction <add>, %48, %cst_10 [1] : vector<8x1792xf32> to vector<8xf32>
    %50 = vector.shape_cast %49 : vector<8xf32> to vector<8x1xf32>
    %cst_11 = arith.constant dense<0.000000e+00> : vector<1xf32>
    %51 = vector.multi_reduction <add>, %50, %cst_11 [0] : vector<8x1xf32> to vector<1xf32>
    %52 = vector.shape_cast %51 : vector<1xf32> to vector<1x1xf32>
    %53 = arith.addf %37, %52 : vector<1x1xf32>
    %c2032_i32 = arith.constant 2032 : i32
    %54 = tpu.dynamic_rotate %44 by %c2032_i32 dim 1 : vector<8x2048xf32>, i32 -> vector<8x2048xf32>
    %55 = arith.subf %54, %44 : vector<8x2048xf32>
    %56 = arith.mulf %55, %55 : vector<8x2048xf32>
    %cst_12 = arith.constant 0.000000e+00 : f32
    %57 = vector.shape_cast %18 : vector<1x2048xi1> to vector<1x2048xi1>
    %58 = vector.broadcast %57 : vector<1x2048xi1> to vector<8x2048xi1>
    %59 = vector.broadcast %cst_12 : f32 to vector<8x2048xf32>
    %60 = arith.select %58, %56, %59 : vector<8x2048xi1>, vector<8x2048xf32>
    %cst_13 = arith.constant dense<0.000000e+00> : vector<8xf32>
    %61 = vector.multi_reduction <add>, %60, %cst_13 [1] : vector<8x2048xf32> to vector<8xf32>
    %62 = vector.shape_cast %61 : vector<8xf32> to vector<8x1xf32>
    %cst_14 = arith.constant dense<0.000000e+00> : vector<1xf32>
    %63 = vector.multi_reduction <add>, %62, %cst_14 [0] : vector<8x1xf32> to vector<1xf32>
    %64 = vector.shape_cast %63 : vector<1xf32> to vector<1x1xf32>
    %65 = arith.addf %37, %64 : vector<1x1xf32>
    %c2047_i32 = arith.constant 2047 : i32
    %66 = tpu.dynamic_rotate %44 by %c2047_i32 dim 1 : vector<8x2048xf32>, i32 -> vector<8x2048xf32>
    %67 = arith.subf %66, %44 : vector<8x2048xf32>
    %68 = arith.mulf %67, %67 : vector<8x2048xf32>
    %cst_15 = arith.constant 0.000000e+00 : f32
    %69 = vector.shape_cast %36 : vector<1x2048xi1> to vector<1x2048xi1>
    %70 = vector.broadcast %69 : vector<1x2048xi1> to vector<8x2048xi1>
    %71 = vector.broadcast %cst_15 : f32 to vector<8x2048xf32>
    %72 = arith.select %70, %68, %71 : vector<8x2048xi1>, vector<8x2048xf32>
    %cst_16 = arith.constant dense<0.000000e+00> : vector<8xf32>
    %73 = vector.multi_reduction <add>, %72, %cst_16 [1] : vector<8x2048xf32> to vector<8xf32>
    %74 = vector.shape_cast %73 : vector<8xf32> to vector<8x1xf32>
    %cst_17 = arith.constant dense<0.000000e+00> : vector<1xf32>
    %75 = vector.multi_reduction <add>, %74, %cst_17 [0] : vector<8x1xf32> to vector<1xf32>
    %76 = vector.shape_cast %75 : vector<1xf32> to vector<1x1xf32>
    %77 = arith.addf %37, %76 : vector<1x1xf32>
    %c1_i32_18 = arith.constant 1 : i32
    %78 = tpu.iota {dimensions = array<i32: 2>} : vector<1x1x128xi32>
    %c0_i32_19 = arith.constant 0 : i32
    %79 = vector.broadcast %c0_i32_19 : i32 to vector<1x1x128xi32>
    %80 = arith.cmpi eq, %78, %79 : vector<1x1x128xi32>
    %c1_i32_20 = arith.constant 1 : i32
    %81 = vector.broadcast %c1_i32_20 : i32 to vector<1x1x128xi32>
    %82 = arith.cmpi eq, %78, %81 : vector<1x1x128xi32>
    %c2_i32 = arith.constant 2 : i32
    %83 = vector.broadcast %c2_i32 : i32 to vector<1x1x128xi32>
    %84 = arith.cmpi eq, %78, %83 : vector<1x1x128xi32>
    %cst_21 = arith.constant 0.000000e+00 : f32
    %85 = vector.shape_cast %77 : vector<1x1xf32> to vector<1x1x1xf32>
    %86 = vector.broadcast %85 : vector<1x1x1xf32> to vector<1x1x128xf32>
    %87 = vector.broadcast %cst_21 : f32 to vector<1x1x128xf32>
    %88 = arith.select %84, %86, %87 : vector<1x1x128xi1>, vector<1x1x128xf32>
    %89 = vector.shape_cast %65 : vector<1x1xf32> to vector<1x1x1xf32>
    %90 = vector.broadcast %89 : vector<1x1x1xf32> to vector<1x1x128xf32>
    %91 = arith.select %82, %90, %88 : vector<1x1x128xi1>, vector<1x1x128xf32>
    %92 = vector.shape_cast %53 : vector<1x1xf32> to vector<1x1x1xf32>
    %93 = vector.broadcast %92 : vector<1x1x1xf32> to vector<1x1x128xf32>
    %94 = arith.select %80, %93, %91 : vector<1x1x128xi1>, vector<1x1x128xf32>
    %c0_22 = arith.constant 0 : index
    %c0_23 = arith.constant 0 : index
    %c0_24 = arith.constant 0 : index
    %95 = vector.load %arg3[%c0_22, %c0_23, %c0_24] : memref<1x1x128xf32, #tpu.memory_space<vmem>>, vector<1x1x128xf32>
    tpu.vector_store %arg3[%c0_22, %c0_23, %c0_24], %94 {strides = array<i32>} : memref<1x1x128xf32, #tpu.memory_space<vmem>>, vector<1x1x128xf32>,
    return
  }
  func.func @transform_0(%arg0: i32) -> (i32, i32) {
    %c0_i32 = arith.constant 0 : i32
    %c0_i32_0 = arith.constant 0 : i32
    return %arg0, %c0_i32 : i32, i32
  }
  func.func @transform_1(%arg0: i32) -> (i32, i32) {
    %c0_i32 = arith.constant 0 : i32
    %c0_i32_0 = arith.constant 0 : i32
    return %arg0, %c0_i32 : i32, i32
  }
  func.func @transform_2(%arg0: i32) -> (i32, i32, i32) {
    %c0_i32 = arith.constant 0 : i32
    %c0_i32_0 = arith.constant 0 : i32
    %c0_i32_1 = arith.constant 0 : i32
    return %arg0, %c0_i32, %c0_i32_0 : i32, i32, i32
  }
}

</mosaic_0001>

<bundles_post_ra>
// kernel: tpu_custom_call.1
= control target key start
LH: loop header
LB: loop body
LE: loop exit
PB: predicated region body
PF: predicated region fallthrough
CT: control target
= control target key end

     0   :  { %7 = vsyncpa [#allocation3], 0  ;;  %s1516_s0 = inlined_call_operand.hbm [shape: f32[8,2048], index: 0, kind: input, shape index: {}]   ;;  %s1517_s1 = inlined_call_operand.hbm [shape: f32[8,2048], index: 1, kind: input, shape index: {}]   ;;  %s1518_s2 = inlined_call_operand.hbm [shape: f32[1,1,128], index: 2, kind: output, shape index: {}]  }
   0x1   :  { %8 = vsyncpa [#allocation6], 0 }
   0x2   :  { %9 = vsyncpa [#allocation4], 0  ;;  %s978_s9 = smov [#allocation2]   ;;  %s979_s11 = smov [#allocation5]  }
   0x3   :  { %s16_s10 = sshll.u32 %s978_s9, 4  ;;  %s26_s12 = sshll.u32 %s979_s11, 4  ;;  %s17_s10 = int_to_ptr.vmem [resolvable:$true] %s16_s10  ;;  %s27_s12 = int_to_ptr.vmem [resolvable:$true] %s26_s12 }
   0x4   :  { %s906_s15 = scalar_lea.hbm %s1516_s0, 2048 }
   0x5   :  { %p907_p0 = scmp.ne.s32.totalorder %s1516_s0, %s906_s15  ;;  %p910_p1 = scmp.lt.u32.totalorder %s906_s15, %s1516_s0 }
   0x7   :  { %p912_p2 = pnand %p910_p1, %p907_p0 }
   0x9   :  { %915 = shalt.err (!%p912_p2)
}
   0xa   :  { %s916_s20 = scalar_lea.vmem %s17_s10, 2048  ;;  %p921_p4 = scmp.lt.s32.totalorder %s17_s10, %s17_s10 }
   0xb   :  { %p917_p3 = scmp.ne.s32.totalorder %s17_s10, %s916_s20  ;;  %p922_p5 = scmp.lt.s32.totalorder %s916_s20, %s916_s20 }
   0xd   :  { %p923_p6 = por %p922_p5, %p921_p4 }
   0xf   :  { %p924_p7 = pnand %p923_p6, %p917_p3 }
  0x11   :  { %927 = shalt.err (!%p924_p7)
}
  0x12   :  { %19 = dma.hbm_to_vmem [thread:$0]  %s1516_s0, 2048, %s17_s10, [#allocation3]  }
  0x13   :  { %s928_s25 = scalar_lea.hbm %s1517_s1, 2048 }
  0x14   :  { %p929_p8 = scmp.ne.s32.totalorder %s1517_s1, %s928_s25  ;;  %p932_p9 = scmp.lt.u32.totalorder %s928_s25, %s1517_s1 }
  0x16   :  { %p934_p10 = pnand %p932_p9, %p929_p8 }
  0x18   :  { %937 = shalt.err (!%p934_p10)
}
  0x19   :  { %s938_s30 = scalar_lea.vmem %s27_s12, 2048  ;;  %p943_p12 = scmp.lt.s32.totalorder %s27_s12, %s27_s12 }
  0x1a   :  { %p939_p11 = scmp.ne.s32.totalorder %s27_s12, %s938_s30  ;;  %p944_p13 = scmp.lt.s32.totalorder %s938_s30, %s938_s30 }
  0x1c   :  { %p945_p0 = por %p944_p13, %p943_p12 }
  0x1e   :  { %p946_p1 = pnand %p945_p0, %p939_p11 }
  0x20   :  { %949 = shalt.err (!%p946_p1)
}
  0x21   :  { %29 = dma.hbm_to_vmem [thread:$0]  %s1517_s1, 2048, %s27_s12, [#allocation6]  }
  0x22   :  { %972 = dma.done.wait [#allocation3], 2048  }
  0x23   :  { %973 = vsyncadd [#allocation3], 4294965248 }
  0x24   :  { %974 = dma.done.wait [#allocation6], 2048  }
  0x25   :  { %975 = vsyncadd [#allocation6], 4294965248  ;;  %v474_v0 = vld [vmem:[#allocation2 + $0x10] sm:$0xff]  ;;  %v472_v2 = vld [vmem:[#allocation2] sm:$0xff]  ;;  %s980_s4 = smov 127   ;;  %s981_s1 = smov 112   ;;  %v36_v48 = vlaneseq }
  0x26   :  { %v492_v1 = vld [vmem:[#allocation5 + $0x10] sm:$0xff]  ;;  %v490_v4 = vld [vmem:[#allocation5] sm:$0xff]  ;;  %v473_v5 = vld [vmem:[#allocation2 + $0x8] sm:$0xff]  ;;  %s982_s5 = smov [#allocation7]  }
  0x27   :  { %v1022_v3 = vsub.f32 %v474_v0, %v492_v1  ;;  %v491_v6 = vld [vmem:[#allocation5 + $0x8] sm:$0xff]  ;;  %v1024_v7 = vsub.f32 %v472_v2, %v490_v4  ;;  %v475_v9 = vld [vmem:[#allocation2 + $0x18] sm:$0xff]  ;;  %v476_v12 = vld [vmem:[#allocation2 + $0x20] sm:$0xff]  ;;  %v1122_v51 = vand.u32 127, %v36_v48  ;;  %s891_s6 = sshll.u32 %s982_s5, 4  ;;  %s892_s6 = int_to_ptr.vmem [resolvable:$true] %s891_s6 }
  0x28   :  { %v1028_v8 = vsub.f32 %v473_v5, %v491_v6  ;;  %v493_v10 = vld [vmem:[#allocation5 + $0x18] sm:$0xff]  ;;  %v494_v13 = vld [vmem:[#allocation5 + $0x20] sm:$0xff]  ;;  %v477_v15 = vld [vmem:[#allocation2 + $0x28] sm:$0xff]  ;;  %s950_s7 = scalar_lea.vmem %s892_s6, 16  ;;  %s954_s8 = scalar_lea.vmem %s892_s6, 32 }
  0x29   :  { %729 = vrot.lane.b32.xlu1 %v1022_v3, %s980_s4  ;;  %725 = vrot.lane.b32.xlu0 %v1024_v7, %s980_s4  ;;  %v1038_v11 = vsub.f32 %v475_v9, %v493_v10  ;;  %v1044_v14 = vsub.f32 %v476_v12, %v494_v13  ;;  %v495_v16 = vld [vmem:[#allocation5 + $0x28] sm:$0xff]  ;;  %v478_v18 = vld [vmem:[#allocation2 + $0x30] sm:$0xff]  ;;  %v479_v21 = vld [vmem:[#allocation2 + $0x38] sm:$0xff]  ;;  %v522_v54 = vsub.f32 %v1022_v3, %v1024_v7  ;;  %v38_v56 = vadd.s32 128, %v1122_v51  ;;  %p951_p2 = scmp.ne.s32.totalorder %s892_s6, %s950_s7  ;;  %p955_p3 = scmp.lt.s32.totalorder %s892_s6, %s892_s6 }
  0x2a   :  { %v1050_v17 = vsub.f32 %v477_v15, %v495_v16  ;;  %v496_v19 = vld [vmem:[#allocation5 + $0x30] sm:$0xff]  ;;  %v497_v22 = vld [vmem:[#allocation5 + $0x38] sm:$0xff]  ;;  %v480_v24 = vld [vmem:[#allocation2 + $0x40] sm:$0xff]  ;;  %vm604_vm0 = vcmp.lt.s32.totalorder %v1122_v51, 112  ;;  %v1135_v61 = vadd.s32 384, %v1122_v51  ;;  %v1140_v0 = vadd.s32 256, %v1122_v51  ;;  %p956_p4 = scmp.lt.s32.totalorder %s954_s8, %s950_s7 }
  0x2b   :  { %v1056_v20 = vsub.f32 %v478_v18, %v496_v19  ;;  %v1062_v23 = vsub.f32 %v479_v21, %v497_v22  ;;  %v498_v25 = vld [vmem:[#allocation5 + $0x40] sm:$0xff]  ;;  %v481_v27 = vld [vmem:[#allocation2 + $0x48] sm:$0xff]  ;;  %v482_v30 = vld [vmem:[#allocation2 + $0x50] sm:$0xff]  ;;  %v523_v55 = vsub.f32 %v1038_v11, %v1028_v8  ;;  %v64_v58 = vand.u32 255, %v38_v56 }
  0x2c   :  { %v1068_v26 = vsub.f32 %v480_v24, %v498_v25  ;;  %v499_v28 = vld [vmem:[#allocation5 + $0x48] sm:$0xff]  ;;  %v500_v31 = vld [vmem:[#allocation5 + $0x50] sm:$0xff]  ;;  %v483_v33 = vld [vmem:[#allocation2 + $0x58] sm:$0xff]  ;;  %v536_v60 = vmul.f32 %v522_v54, %v522_v54  ;;  %v524_v62 = vsub.f32 %v1044_v14, %v1022_v3  ;;  %v265_v1 = vand.u32 15, %v1122_v51  ;;  %p957_p5 = por %p956_p4, %p955_p3 }
  0x2d   :  { %574 = vrot.lane.b32.xlu1 %v1028_v8, %s981_s1  ;;  %727 = vrot.lane.b32.xlu0 %v1028_v8, %s980_s4  ;;  %v1074_v29 = vsub.f32 %v481_v27, %v499_v28  ;;  %v1080_v32 = vsub.f32 %v482_v30, %v500_v31  ;;  %v501_v34 = vld [vmem:[#allocation5 + $0x58] sm:$0xff]  ;;  %v484_v36 = vld [vmem:[#allocation2 + $0x60] sm:$0xff]  ;;  %v485_v39 = vld [vmem:[#allocation2 + $0x68] sm:$0xff]  ;;  %v537_v63 = vmul.f32 %v523_v55, %v523_v55  ;;  %vm757_vm1 = vcmp.lt.s32.totalorder %v1122_v51, 127 }
  0x2e   :  { %v1086_v35 = vsub.f32 %v483_v33, %v501_v34  ;;  %v502_v37 = vld [vmem:[#allocation5 + $0x60] sm:$0xff]  ;;  %v503_v40 = vld [vmem:[#allocation5 + $0x68] sm:$0xff]  ;;  %v486_v42 = vld [vmem:[#allocation2 + $0x70] sm:$0xff]  ;;  %v1147_v5 = vadd.s32 512, %v1122_v51  ;;  %v272_v6 = vand.u32 15, %v38_v56  ;;  %vm1149_vm2 = vcmp.lt.s32.totalorder %v64_v58, 240  ;;  %p958_p6 = pnand %p957_p5, %p951_p2 }
  0x2f   :  { %v1092_v38 = vsub.f32 %v484_v36, %v502_v37  ;;  %v1098_v41 = vsub.f32 %v485_v39, %v503_v40  ;;  %v504_v43 = vld [vmem:[#allocation5 + $0x70] sm:$0xff]  ;;  %v487_v45 = vld [vmem:[#allocation2 + $0x78] sm:$0xff]  ;;  %v1156_v12 = vadd.s32 640, %v1122_v51  ;;  %v1159_v13 = vadd.s32 768, %v1122_v51 }
  0x30   :  { %v1104_v44 = vsub.f32 %v486_v42, %v504_v43  ;;  %v505_v46 = vld [vmem:[#allocation5 + $0x78] sm:$0xff]  ;;  %v78_v15 = vand.u32 255, %v1135_v61  ;;  %v525_v16 = vsub.f32 %v1050_v17, %v1038_v11  ;;  %v538_v18 = vmul.f32 %v524_v62, %v524_v62 }
  0x31   :  { %572 = vrot.lane.b32.xlu1 %v1024_v7, %s981_s1  ;;  %576 = vrot.lane.b32.xlu0 %v1022_v3, %s981_s1  ;;  %v1110_v47 = vsub.f32 %v487_v45, %v505_v46  ;;  %v550_v19 = vadd.f32 %v537_v63, %v536_v60  ;;  %v279_v24 = vand.u32 15, %v1140_v0  ;;  %v1170_v25 = vadd.s32 896, %v1122_v51 }
  0x32   :  { %v286_v28 = vand.u32 15, %v1135_v61  ;;  %v1175_v31 = vadd.s32 1024, %v1122_v51  ;;  %v1178_v33 = vadd.s32 1152, %v1122_v51  ;;  %v92_v36 = vand.u32 255, %v1156_v12 }
  0x33   :  { %v526_v40 = vsub.f32 %v1056_v20, %v1044_v14  ;;  %vm1188_vm3 = vcmp.lt.s32.totalorder %v78_v15, 240  ;;  %v539_v46 = vmul.f32 %v525_v16, %v525_v16  ;;  %v551_v48 = vadd.f32 %v550_v19, %v538_v18 }
  0x34   :  { %v106_v55 = vand.u32 255, %v1170_v25  ;;  %v1198_v56 = vadd.s32 1280, %v1122_v51  ;;  %v527_v0 = vsub.f32 %v1062_v23, %v1050_v17  ;;  %vm1211_vm4 = vcmp.ne.s32.totalorder %v265_v1, 15 }
  0x35   :  { %578 = vrot.lane.b32.xlu1 %v1038_v11, %s981_s1  ;;  %731 = vrot.lane.b32.xlu0 %v1038_v11, %s980_s4  ;;  %v540_v16 = vmul.f32 %v526_v40, %v526_v40  ;;  %vm1215_vm5 = vcmp.ne.s32.totalorder %v272_v6, 15  ;;  %v552_v62 = vadd.f32 %v551_v48, %v539_v46  ;;  %v1228_v15 = vadd.s32 1408, %v1122_v51 }
  0x36   :  { %v1231_v6 = vadd.s32 1536, %v1122_v51  ;;  %vm1238_vm6 = vcmp.lt.s32.totalorder %v92_v36, 240  ;;  %v528_v46 = vsub.f32 %v1068_v26, %v1056_v20  ;;  %v541_v48 = vmul.f32 %v527_v0, %v527_v0 }
  0x37   :  { %vm1245_vm7 = vcmp.ne.s32.totalorder %v279_v24, 15  ;;  %v1254_v39 = vadd.s32 1664, %v1122_v51  ;;  %v553_v0 = vadd.f32 %v552_v62, %v540_v16  ;;  %vm1268_vm8 = vcmp.ne.s32.totalorder %v286_v28, 15 }
  0x38   :  { %vm1285_vm10 = vcmp.lt.s32.totalorder %v106_v55, 240 }
  0x39   :  { %580 = vrot.lane.b32.xlu1 %v1044_v14, %s981_s1  ;;  %733 = vrot.lane.b32.xlu0 %v1044_v14, %s980_s4  ;;  %v148_v43 = vand.u32 255, %v1254_v39 }
  0x3d   :  { %582 = vrot.lane.b32.xlu1 %v1050_v17, %s981_s1  ;;  %735 = vrot.lane.b32.xlu0 %v1050_v17, %s980_s4 }
  0x41   :  { %584 = vrot.lane.b32.xlu1 %v1056_v20, %s981_s1  ;;  %737 = vrot.lane.b32.xlu0 %v1056_v20, %s980_s4 }
  0x45   :  { %586 = vrot.lane.b32.xlu1 %v1062_v23, %s981_s1  ;;  %739 = vrot.lane.b32.xlu0 %v1062_v23, %s980_s4 }
  0x49   :  { %588 = vrot.lane.b32.xlu1 %v1068_v26, %s981_s1  ;;  %741 = vrot.lane.b32.xlu0 %v1068_v26, %s980_s4 }
  0x4d   :  { %590 = vrot.lane.b32.xlu1 %v1074_v29, %s981_s1  ;;  %743 = vrot.lane.b32.xlu0 %v1074_v29, %s980_s4 }
  0x51   :  { %592 = vrot.lane.b32.xlu1 %v1080_v32, %s981_s1  ;;  %745 = vrot.lane.b32.xlu0 %v1080_v32, %s980_s4 }
  0x55   :  { %594 = vrot.lane.b32.xlu1 %v1086_v35, %s981_s1  ;;  %747 = vrot.lane.b32.xlu0 %v1086_v35, %s980_s4 }
  0x59   :  { %596 = vrot.lane.b32.xlu1 %v1092_v38, %s981_s1  ;;  %749 = vrot.lane.b32.xlu0 %v1092_v38, %s980_s4 }
  0x5d   :  { %598 = vrot.lane.b32.xlu1 %v1098_v41, %s981_s1  ;;  %751 = vrot.lane.b32.xlu0 %v1098_v41, %s980_s4 }
  0x61   :  { %600 = vrot.lane.b32.xlu1 %v1104_v44, %s981_s1  ;;  %753 = vrot.lane.b32.xlu0 %v1104_v44, %s980_s4 }
  0x65   :  { %602 = vrot.lane.b32.xlu1 %v1110_v47, %s981_s1  ;;  %755 = vrot.lane.b32.xlu0 %v1110_v47, %s980_s4 }
  0x9b   :  { %v1118_v49 = vpop.permute.xlu1 %729  ;;  %v1120_v50 = vpop.permute.xlu0 %725 }
  0x9f   :  { %v575_v52 = vpop.permute.xlu1 %574  ;;  %v1124_v53 = vpop.permute.xlu0 %727 }
  0xa3   :  { %v1131_v57 = vpop.permute.xlu1 %572  ;;  %v577_v59 = vpop.permute.xlu0 %576 }
  0xa4   :  { %v618_v2 = vsel %vm604_vm0, %v575_v52, %v577_v59  ;;  %v619_v21 = vsel %vm604_vm0, %v1131_v57, %v575_v52 }
  0xa5   :  { %v622_v22 = vsub.f32 %v618_v2, %v1028_v8  ;;  %v621_v42 = vsub.f32 %v619_v21, %v1024_v7  ;;  %v771_v21 = vsel %vm757_vm1, %v1124_v53, %v1118_v49 }
  0xa7   :  { %v579_v4 = vpop.permute.xlu1 %578  ;;  %v1153_v10 = vpop.permute.xlu0 %731  ;;  %v638_v52 = vmul.f32 %v622_v22, %v622_v22  ;;  %v637_v22 = vmul.f32 %v621_v42, %v621_v42 }
  0xa8   :  { %v617_v54 = vsel %vm604_vm0, %v577_v59, %v579_v4  ;;  %v772_v59 = vsel %vm757_vm1, %v1120_v50, %v1124_v53  ;;  %v770_v53 = vsel %vm757_vm1, %v1118_v49, %v1153_v10 }
  0xa9   :  { %v686_v40 = vsel %vm1149_vm2, %v638_v52, 0.0  ;;  %v774_v60 = vsub.f32 %v772_v59, %v1024_v7  ;;  %v775_v52 = vsub.f32 %v771_v21, %v1028_v8  ;;  %v776_v8 = vsub.f32 %v770_v53, %v1022_v3 }
  0xaa   :  { %v701_v1 = vadd.f32 %v686_v40, %v637_v22  ;;  %v134_v21 = vand.u32 255, %v1228_v15  ;;  %v529_v22 = vsub.f32 %v1074_v29, %v1062_v23 }
  0xab   :  { %v581_v27 = vpop.permute.xlu1 %580  ;;  %v1180_v34 = vpop.permute.xlu0 %733  ;;  %v790_v40 = vmul.f32 %v774_v60, %v774_v60  ;;  %v791_v30 = vmul.f32 %v775_v52, %v775_v52  ;;  %v554_v52 = vadd.f32 %v553_v0, %v541_v48 }
  0xac   :  { %v616_v45 = vsel %vm604_vm0, %v579_v4, %v581_v27  ;;  %v769_v16 = vsel %vm757_vm1, %v1153_v10, %v1180_v34  ;;  %v792_v10 = vmul.f32 %v776_v8, %v776_v8 }
  0xad   :  { %v624_v2 = vsub.f32 %v616_v45, %v1038_v11  ;;  %v623_v45 = vsub.f32 %v617_v54, %v1022_v3  ;;  %v838_v8 = vsel %vm1211_vm4, %v790_v40, 0.0 }
  0xaf   :  { %v583_v58 = vpop.permute.xlu1 %582  ;;  %v736_v4 = vpop.permute.xlu0 %735  ;;  %v640_v7 = vmul.f32 %v624_v2, %v624_v2  ;;  %v639_v63 = vmul.f32 %v623_v45, %v623_v45  ;;  %v342_v2 = vand.u32 15, %v1228_v15  ;;  %v542_v45 = vmul.f32 %v528_v46, %v528_v46 }
  0xb0   :  { %v615_v59 = vsel %vm604_vm0, %v581_v27, %v583_v58  ;;  %v1533_v46 = vand.u32 15, %v1147_v5  ;;  %v768_v61 = vsel %vm757_vm1, %v1180_v34, %v736_v4  ;;  %v1538_v34 = vand.u32 15, %v1156_v12 }
  0xb1   :  { %v625_v27 = vsub.f32 %v615_v59, %v1044_v14  ;;  %v688_v3 = vsel %vm1188_vm3, %v640_v7, 0.0  ;;  %v702_v59 = vadd.f32 %v701_v1, %v639_v63  ;;  %v356_v63 = vand.u32 15, %v1254_v39 }
  0xb2   :  { %vm1278_vm9 = vcmp.ne.s32.totalorder %v1533_v46, 15  ;;  %vm1296_vm11 = vcmp.ne.s32.totalorder %v1538_v34, 15  ;;  %v555_v40 = vadd.f32 %v554_v52, %v542_v45  ;;  %vm1383_vm3 = vcmp.lt.s32.totalorder %v134_v21, 240 }
  0xb3   :  { %v585_v9 = vpop.permute.xlu1 %584  ;;  %v738_v36 = vpop.permute.xlu0 %737  ;;  %v703_v1 = vadd.f32 %v702_v59, %v688_v3  ;;  %v641_v46 = vmul.f32 %v625_v27, %v625_v27 }
  0xb4   :  { %v614_v49 = vsel %vm604_vm0, %v583_v58, %v585_v9  ;;  %v349_v58 = vand.u32 15, %v1231_v6  ;;  %v767_v48 = vsel %vm757_vm1, %v736_v4, %v738_v36  ;;  %v530_v4 = vsub.f32 %v1080_v32, %v1068_v26 }
  0xb5   :  { %v626_v24 = vsub.f32 %v614_v49, %v1050_v17  ;;  %v777_v49 = vsub.f32 %v769_v16, %v1038_v11  ;;  %v543_v16 = vmul.f32 %v529_v22, %v529_v22  ;;  %v779_v19 = vsub.f32 %v767_v48, %v1050_v17 }
  0xb6   :  { %v1547_v48 = vand.u32 15, %v1170_v25 }
  0xb7   :  { %v587_v37 = vpop.permute.xlu1 %586  ;;  %v740_v53 = vpop.permute.xlu0 %739  ;;  %v642_v7 = vmul.f32 %v626_v24, %v626_v24  ;;  %v778_v24 = vsub.f32 %v768_v61, %v1044_v14  ;;  %v840_v61 = vsel %vm1245_vm7, %v792_v10, 0.0  ;;  %v793_v22 = vmul.f32 %v777_v49, %v777_v49 }
  0xb8   :  { %v613_v5 = vsel %vm604_vm0, %v585_v9, %v587_v37  ;;  %v839_v9 = vsel %vm1215_vm5, %v791_v30, 0.0  ;;  %v1541_v30 = vand.u32 15, %v1159_v13  ;;  %vm1334_vm14 = vcmp.ne.s32.totalorder %v1547_v48, 15 }
  0xb9   :  { %v627_v27 = vsub.f32 %v613_v5, %v1056_v20  ;;  %v690_v18 = vsel %vm1238_vm6, %v642_v7, 0.0  ;;  %v854_v59 = vadd.f32 %v839_v9, %v838_v8  ;;  %v704_v5 = vadd.f32 %v703_v1, %v641_v46 }
  0xba   :  { %vm1318_vm12 = vcmp.ne.s32.totalorder %v1541_v30, 15  ;;  %v1544_v7 = vand.u32 255, %v1178_v33  ;;  %v794_v13 = vmul.f32 %v778_v24, %v778_v24  ;;  %v1550_v46 = vand.u32 15, %v1175_v31 }
  0xbb   :  { %v589_v0 = vpop.permute.xlu1 %588  ;;  %v742_v12 = vpop.permute.xlu0 %741  ;;  %v705_v10 = vadd.f32 %v704_v5, %v690_v18  ;;  %v643_v1 = vmul.f32 %v627_v27, %v627_v27  ;;  %v795_v9 = vmul.f32 %v779_v19, %v779_v19  ;;  %v531_v24 = vsub.f32 %v1086_v35, %v1074_v29 }
  0xbc   :  { %v612_v11 = vsel %vm604_vm0, %v587_v37, %v589_v0  ;;  %v766_v37 = vsel %vm757_vm1, %v738_v36, %v740_v53  ;;  %vm1328_vm13 = vcmp.lt.s32.totalorder %v1544_v7, 240  ;;  %v765_v54 = vsel %vm757_vm1, %v740_v53, %v742_v12 }
  0xbd   :  { %v628_v3 = vsub.f32 %v612_v11, %v1062_v23  ;;  %v780_v49 = vsub.f32 %v766_v37, %v1056_v20  ;;  %vm1345_vm15 = vcmp.ne.s32.totalorder %v1550_v46, 15  ;;  %v1352_v53 = vadd.s32 1920, %v1122_v51 }
  0xbe   :  { %v855_v20 = vadd.f32 %v854_v59, %v840_v61  ;;  %v841_v31 = vsel %vm1268_vm8, %v793_v22, 0.0  ;;  %v781_v11 = vsub.f32 %v765_v54, %v1062_v23  ;;  %v706_v59 = vadd.f32 %v705_v10, %v643_v1 }
  0xbf   :  { %v591_v42 = vpop.permute.xlu1 %590  ;;  %v644_v34 = vmul.f32 %v628_v3, %v628_v3  ;;  %v744_v52 = vpop.permute.xlu0 %743  ;;  %v796_v62 = vmul.f32 %v780_v49, %v780_v49  ;;  %v1553_v23 = vand.u32 15, %v1178_v33  ;;  %v556_v7 = vadd.f32 %v555_v40, %v543_v16 }
  0xc0   :  { %v611_v45 = vsel %vm604_vm0, %v589_v0, %v591_v42  ;;  %v764_v25 = vsel %vm757_vm1, %v742_v12, %v744_v52  ;;  %v1355_v0 = vadd.s32 1792, %v1122_v51  ;;  %v842_v12 = vsel %vm1278_vm9, %v794_v13, 0.0 }
  0xc1   :  { %v629_v27 = vsub.f32 %v611_v45, %v1068_v26  ;;  %v692_v18 = vsel %vm1285_vm10, %v644_v34, 0.0  ;;  %v782_v19 = vsub.f32 %v764_v25, %v1068_v26  ;;  %vm1373_vm2 = vcmp.ne.s32.totalorder %v1553_v23, 15 }
  0xc2   :  { %v856_v28 = vadd.f32 %v855_v20, %v841_v31  ;;  %v843_v26 = vsel %vm1296_vm11, %v795_v9, 0.0  ;;  %v707_v33 = vadd.f32 %v706_v59, %v692_v18  ;;  %v797_v13 = vmul.f32 %v781_v11, %v781_v11 }
  0xc3   :  { %v593_v3 = vpop.permute.xlu1 %592  ;;  %v746_v37 = vpop.permute.xlu0 %745  ;;  %v645_v34 = vmul.f32 %v629_v27, %v629_v27  ;;  %v1558_v45 = vand.u32 15, %v1198_v56  ;;  %v798_v10 = vmul.f32 %v782_v19, %v782_v19  ;;  %v844_v16 = vsel %vm1318_vm12, %v796_v62, 0.0 }
  0xc4   :  { %v610_v30 = vsel %vm604_vm0, %v591_v42, %v593_v3  ;;  %v763_v60 = vsel %vm757_vm1, %v744_v52, %v746_v37  ;;  %v544_v42 = vmul.f32 %v530_v4, %v530_v4  ;;  %v857_v55 = vadd.f32 %v856_v28, %v842_v12 }
  0xc5   :  { %v630_v61 = vsub.f32 %v610_v30, %v1074_v29  ;;  %vm1389_vm4 = vcmp.ne.s32.totalorder %v1558_v45, 15  ;;  %v783_v21 = vsub.f32 %v763_v60, %v1074_v29  ;;  %vm1403_vm5 = vcmp.ne.s32.totalorder %v342_v2, 15 }
  0xc6   :  { %v162_v29 = vand.u32 255, %v1352_v53  ;;  %v858_v46 = vadd.f32 %v857_v55, %v843_v26  ;;  %v532_v9 = vsub.f32 %v1092_v38, %v1080_v32  ;;  %v845_v20 = vsel %vm1334_vm14, %v797_v13, 0.0 }
  0xc7   :  { %v646_v48 = vmul.f32 %v630_v61, %v630_v61  ;;  %v595_v54 = vpop.permute.xlu1 %594  ;;  %v748_v4 = vpop.permute.xlu0 %747  ;;  %v708_v31 = vadd.f32 %v707_v33, %v645_v34  ;;  %v545_v2 = vmul.f32 %v531_v24, %v531_v24  ;;  %v557_v11 = vadd.f32 %v556_v7, %v544_v42 }
  0xc8   :  { %v609_v1 = vsel %vm604_vm0, %v593_v3, %v595_v54  ;;  %v762_v56 = vsel %vm757_vm1, %v746_v37, %v748_v4  ;;  %v859_v27 = vadd.f32 %v858_v46, %v844_v16  ;;  %v846_v3 = vsel %vm1345_vm15, %v798_v10, 0.0 }
  0xc9   :  { %v631_v40 = vsub.f32 %v609_v1, %v1080_v32  ;;  %v694_v25 = vsel %vm1328_vm13, %v646_v48, 0.0  ;;  %v784_v14 = vsub.f32 %v762_v56, %v1080_v32  ;;  %v799_v12 = vmul.f32 %v783_v21, %v783_v21 }
  0xca   :  { %v709_v19 = vadd.f32 %v708_v31, %v694_v25  ;;  %vm1424_vm6 = vcmp.ne.s32.totalorder %v349_v58, 15  ;;  %v860_v8 = vadd.f32 %v859_v27, %v845_v20  ;;  %vm1431_vm7 = vcmp.lt.s32.totalorder %v148_v43, 240 }
  0xcb   :  { %v597_v15 = vpop.permute.xlu1 %596  ;;  %v750_v18 = vpop.permute.xlu0 %749  ;;  %v647_v30 = vmul.f32 %v631_v40, %v631_v40  ;;  %v800_v37 = vmul.f32 %v784_v14, %v784_v14  ;;  %v533_v61 = vsub.f32 %v1098_v41, %v1086_v35  ;;  %vm1439_vm8 = vcmp.ne.s32.totalorder %v356_v63, 15 }
  0xcc   :  { %v608_v17 = vsel %vm604_vm0, %v595_v54, %v597_v15  ;;  %v761_v36 = vsel %vm757_vm1, %v748_v4, %v750_v18  ;;  %v363_v58 = vand.u32 15, %v1355_v0  ;;  %v546_v28 = vmul.f32 %v532_v9, %v532_v9 }
  0xcd   :  { %v632_v32 = vsub.f32 %v608_v17, %v1086_v35  ;;  %v785_v59 = vsub.f32 %v761_v36, %v1086_v35  ;;  %v558_v26 = vadd.f32 %v557_v11, %v545_v2  ;;  %v861_v42 = vadd.f32 %v860_v8, %v846_v3 }
  0xce   :  { %v847_v43 = vsel %vm1373_vm2, %v799_v12, 0.0  ;;  %v710_v13 = vadd.f32 %v709_v19, %v647_v30  ;;  %v848_v34 = vsel %vm1389_vm4, %v800_v37, 0.0  ;;  %v534_v48 = vsub.f32 %v1104_v44, %v1092_v38 }
  0xcf   :  { %v648_v23 = vmul.f32 %v632_v32, %v632_v32  ;;  %v599_v60 = vpop.permute.xlu1 %598  ;;  %v801_v7 = vmul.f32 %v785_v59, %v785_v59  ;;  %v752_v33 = vpop.permute.xlu0 %751  ;;  %v547_v54 = vmul.f32 %v533_v61, %v533_v61  ;;  %v862_v45 = vadd.f32 %v861_v42, %v847_v43 }
  0xd0   :  { %v607_v35 = vsel %vm604_vm0, %v597_v15, %v599_v60  ;;  %v760_v0 = vsel %vm757_vm1, %v750_v18, %v752_v33  ;;  %v559_v5 = vadd.f32 %v558_v26, %v546_v28  ;;  %v370_v40 = vand.u32 15, %v1352_v53 }
  0xd1   :  { %v696_v39 = vsel %vm1383_vm3, %v648_v23, 0.0  ;;  %v633_v63 = vsub.f32 %v607_v35, %v1092_v38  ;;  %v786_v22 = vsub.f32 %v760_v0, %v1092_v38  ;;  %v849_v1 = vsel %vm1403_vm5, %v801_v7, 0.0 }
  0xd2   :  { %v711_v55 = vadd.f32 %v710_v13, %v696_v39  ;;  %v863_v56 = vadd.f32 %v862_v45, %v848_v34  ;;  %vm1466_vm9 = vcmp.lt.s32.totalorder %v162_v29, 240  ;;  %vm1471_vm10 = vcmp.ne.s32.totalorder %v363_v58, 15 }
  0xd3   :  { %v649_v10 = vmul.f32 %v633_v63, %v633_v63  ;;  %v601_v21 = vpop.permute.xlu1 %600  ;;  %v802_v4 = vmul.f32 %v786_v22, %v786_v22  ;;  %v754_v52 = vpop.permute.xlu0 %753  ;;  %v535_v9 = vsub.f32 %v1110_v47, %v1098_v41  ;;  %v548_v53 = vmul.f32 %v534_v48, %v534_v48 }
  0xd4   :  { %v606_v16 = vsel %vm604_vm0, %v599_v60, %v601_v21  ;;  %v759_v38 = vsel %vm757_vm1, %v752_v33, %v754_v52  ;;  %v864_v20 = vadd.f32 %v863_v56, %v849_v1  ;;  %v560_v11 = vadd.f32 %v559_v5, %v547_v54 }
  0xd5   :  { %v634_v46 = vsub.f32 %v606_v16, %v1098_v41  ;;  %v787_v49 = vsub.f32 %v759_v38, %v1098_v41  ;;  %v712_v31 = vadd.f32 %v711_v55, %v649_v10  ;;  %v850_v29 = vsel %vm1424_vm6, %v802_v4, 0.0 }
  0xd6   :  { %v865_v8 = vadd.f32 %v864_v20, %v850_v29  ;;  %v561_v42 = vadd.f32 %v560_v11, %v548_v53  ;;  %vm879_vm11 = vcmp.eq.s32.totalorder %v1122_v51, 1  ;;  %vm878_vm12 = vcmp.eq.s32.totalorder %v1122_v51, 0 }
  0xd7   :  { %v650_v15 = vmul.f32 %v634_v46, %v634_v46  ;;  %v603_v2 = vpop.permute.xlu1 %602  ;;  %v803_v27 = vmul.f32 %v787_v49, %v787_v49  ;;  %v756_v17 = vpop.permute.xlu0 %755 }
  0xd8   :  { %v605_v3 = vsel %vm604_vm0, %v601_v21, %v603_v2  ;;  %v620_v12 = vsel %vm604_vm0, %v603_v2, %v1131_v57  ;;  %v758_v30 = vsel %vm757_vm1, %v754_v52, %v756_v17  ;;  %v773_v36 = vsel %vm757_vm1, %v756_v17, %v1120_v50 }
  0xd9   :  { %v698_v41 = vsel %vm1431_vm7, %v650_v15, 0.0  ;;  %v635_v18 = vsub.f32 %v605_v3, %v1104_v44  ;;  %v636_v19 = vsub.f32 %v620_v12, %v1110_v47  ;;  %v851_v32 = vsel %vm1439_vm8, %v803_v27, 0.0 }
  0xda   :  { %v788_v57 = vsub.f32 %v758_v30, %v1104_v44  ;;  %v713_v24 = vadd.f32 %v712_v31, %v698_v41  ;;  %v789_v62 = vsub.f32 %v773_v36, %v1110_v47  ;;  %vm468_vm0 = vcmp.ne.s32.totalorder %v370_v40, 15 }
  0xdb   :  { %v651_v37 = vmul.f32 %v635_v18, %v635_v18  ;;  %v652_v59 = vmul.f32 %v636_v19, %v636_v19  ;;  %v866_v58 = vadd.f32 %v865_v8, %v851_v32  ;;  %v549_v44 = vmul.f32 %v535_v9, %v535_v9 }
  0xdc   :  { %v804_v61 = vmul.f32 %v788_v57, %v788_v57  ;;  %v805_v23 = vmul.f32 %v789_v62, %v789_v62  ;;  %vm880_vm1 = vcmp.eq.s32.totalorder %v1122_v51, 2 }
  0xdd   :  { %v700_v60 = vsel %vm1466_vm9, %v652_v59, 0.0  ;;  %v714_v6 = vadd.f32 %v713_v24, %v651_v37  ;;  %v562_v47 = vadd.f32 %v561_v42, %v549_v44 }
  0xde   :  { %v852_v28 = vsel %vm1471_vm10, %v804_v61, 0.0  ;;  %v853_v43 = vsel %vm468_vm0, %v805_v23, 0.0 }
  0xdf   :  { %v715_v50 = vadd.f32 %v714_v6, %v700_v60  ;;  %v867_v26 = vadd.f32 %v866_v58, %v852_v28 }
  0xe1   :  { %716 = vadd.xlane.f32.xlu1 %v715_v50  ;;  %v868_v7 = vadd.f32 %v867_v26, %v853_v43 }
  0xe3   :  { %869 = vadd.xlane.f32.xlu0 %v868_v7 }
  0xe7   :  { %563 = vadd.xlane.f32.xlu0 %v562_v47 }
 0x16e   :  { %v717_v35 = vpop.xlane.xlu1 %716 }
 0x16f   :  { %v718_v33 = vrot.slane %v717_v35, 4 }
 0x170   :  { %v870_v13 = vpop.xlane.xlu0 %869 }
 0x171   :  { %v719_v39 = vadd.f32 %v718_v33, %v717_v35  ;;  %v871_v63 = vrot.slane %v870_v13, 4 }
 0x173   :  { %v720_v0 = vrot.slane %v719_v39, 2  ;;  %v872_v34 = vadd.f32 %v871_v63, %v870_v13 }
 0x174   :  { %v564_v22 = vpop.xlane.xlu0 %563 }
 0x175   :  { %v873_v48 = vrot.slane %v872_v34, 2  ;;  %v565_v54 = vrot.slane %v564_v22, 4  ;;  %v721_v45 = vadd.f32 %v720_v0, %v719_v39 }
 0x177   :  { %v874_v55 = vadd.f32 %v873_v48, %v872_v34  ;;  %v566_v10 = vadd.f32 %v565_v54, %v564_v22  ;;  %v722_v1 = vrot.slane %v721_v45, 1 }
 0x179   :  { %v875_v21 = vrot.slane %v874_v55, 1  ;;  %v567_v5 = vrot.slane %v566_v10, 2  ;;  %v723_v56 = vadd.f32 %v722_v1, %v721_v45 }
 0x17b   :  { %v876_v4 = vadd.f32 %v875_v21, %v874_v55  ;;  %v568_v16 = vadd.f32 %v567_v5, %v566_v10 }
 0x17d   :  { %v569_v52 = vrot.slane %v568_v16, 1  ;;  %v881_v40 = vsel %vm880_vm1, %v876_v4, 0.0 }
 0x17e   :  { %v882_v38 = vsel %vm879_vm11, %v723_v56, %v881_v40 }
 0x17f   :  { %v570_v46 = vadd.f32 %v569_v52, %v568_v16 }
 0x181   :  { %v883_v25 = vsel %vm878_vm12, %v570_v46, %v882_v38 }
 0x182   :  { %884 = vst [vmem:[#allocation7] sm:$0x1] %v883_v25 }
 0x183   :  { %961 = shalt.err (!%p958_p6)
}
 0x184   :  { %s962_s11 = scalar_lea.hbm %s1518_s2, 16 }
 0x185   :  { %p963_p7 = scmp.ne.s32.totalorder %s1518_s2, %s962_s11  ;;  %p966_p8 = scmp.lt.u32.totalorder %s962_s11, %s1518_s2 }
 0x187   :  { %p968_p9 = pnand %p966_p8, %p963_p7 }
 0x189   :  { %971 = shalt.err (!%p968_p9)
}
 0x18a   :  { %894 = dma.vmem_to_hbm [thread:$0]  %s892_s6, 16, %s1518_s2, [#allocation4]  }
 0x18b   :  { %976 = dma.done.wait [#allocation4], 16  }
 0x18c   :  { %977 = vsyncadd [#allocation4], 4294967280 }
 0x18d   :  { %898 = vsyncpa [#allocation3], 1 }
 0x18e   :  { %899 = vsyncpa [#allocation6], 1 }
 0x18f   :  { %900 = vsyncpa [#allocation4], 1 }

</bundles_post_ra>
